<compile_context>
chip_gen: v5e
topology: v5e:2x2
jax: 0.10.0
libtpu: 0.0.40
codegen_flags: <defaults>
</compile_context>

<pallas_src>
import jax
import jax.numpy as jnp
from jax.experimental import pallas as pl
from jax.experimental.pallas import tpu as pltpu


DEFAULT_TILE_B = 32768  # rows per grid step; big tiles amortize per-step overhead


def _round_up(n: int, m: int) -> int:
    return ((n + m - 1) // m) * m


def attack_model_kernel(xt_ref, w1_ref, b1_ref, w2_ref, b2_ref, ot_ref):
    # fc1: (32, C) @ (C, TILE_B) -> (32, TILE_B); bf16 MXU inputs, f32 accumulate.
    h = jnp.dot(w1_ref[...], xt_ref[...], preferred_element_type=jnp.float32)
    h = jnp.maximum(h + b1_ref[...], 0.0)                 # bias + ReLU on VPU, f32
    # fc2: (2, 32) @ (32, TILE_B) -> (2, TILE_B); tiny, kept in f32.
    logits = jnp.dot(w2_ref[...], h, preferred_element_type=jnp.float32)
    logits = logits + b2_ref[...]
    ot_ref[...] = jax.nn.sigmoid(logits).astype(ot_ref.dtype)   # lane-dense store


def attack_model_forward(x, w1, b1, w2, b2, *, tile_b: int = DEFAULT_TILE_B):
    """x: (B, C); PyTorch-layout params: w1 (32, C), b1 (32,), w2 (2, 32), b2 (2,).
    Returns sigmoid(fc2(relu(fc1(x)))) with shape (B, 2), float32."""
    B, C = x.shape
    H = w1.shape[0]
    O = w2.shape[0]

    tile_b = min(tile_b, _round_up(B, 128))
    b_pad = _round_up(B, tile_b)
    grid = (b_pad // tile_b,)

    # Layout plumbing in XLA: pad batch, cast to bf16, put batch on the lane axis.
    xt = jnp.pad(x, ((0, b_pad - B), (0, 0))).astype(jnp.bfloat16).T   # (C, b_pad)
    w1b = w1.astype(jnp.bfloat16)                                      # (H, C)
    b1c = b1.reshape(H, 1).astype(jnp.float32)
    w2f = w2.astype(jnp.float32)                                       # (O, H)
    b2c = b2.reshape(O, 1).astype(jnp.float32)

    cost = pl.CostEstimate(
        flops=2 * b_pad * (C * H + H * O),
        transcendentals=b_pad * O,                        # one exp per sigmoid
        bytes_accessed=(C * b_pad * 2 + O * b_pad * 4     # x (bf16) + out (f32)
                        + H * C * 2 + H * 4 + O * H * 4 + O * 4),
    )

    out_t = pl.pallas_call(
        attack_model_kernel,
        out_shape=jax.ShapeDtypeStruct((O, b_pad), jnp.float32),
        grid_spec=pltpu.PrefetchScalarGridSpec(
            num_scalar_prefetch=0,
            grid=grid,
            in_specs=[
                pl.BlockSpec((C, tile_b), lambda i: (0, i)),   # x: streamed per tile
                pl.BlockSpec((H, C), lambda i: (0, 0)),        # weights: resident
                pl.BlockSpec((H, 1), lambda i: (0, 0)),
                pl.BlockSpec((O, H), lambda i: (0, 0)),
                pl.BlockSpec((O, 1), lambda i: (0, 0)),
            ],
            out_specs=pl.BlockSpec((O, tile_b), lambda i: (0, i)),
        ),
        compiler_params=pltpu.CompilerParams(
            dimension_semantics=("parallel",)),
        cost_estimate=cost,
    )(xt, w1b, b1c, w2f, b2c)

    # Back to the PyTorch-facing (B, 2) layout; drop batch padding.
    return out_t[:, :B].T


def init_params(key, total_classes, hidden=32, out=2):
    """nn.Linear-style U(-1/sqrt(in), 1/sqrt(in)) init, PyTorch (out, in) layout."""
    k1, k2, k3, k4 = jax.random.split(key, 4)
    lim1 = 1.0 / jnp.sqrt(jnp.float32(total_classes))
    lim2 = 1.0 / jnp.sqrt(jnp.float32(hidden))
    w1 = jax.random.uniform(k1, (hidden, total_classes), jnp.float32, -lim1, lim1)
    b1 = jax.random.uniform(k2, (hidden,), jnp.float32, -lim1, lim1)
    w2 = jax.random.uniform(k3, (out, hidden), jnp.float32, -lim2, lim2)
    b2 = jax.random.uniform(k4, (out,), jnp.float32, -lim2, lim2)
    return w1, b1, w2, b2


if __name__ == "__main__":
    key = jax.random.PRNGKey(0)
    total_classes = 10
    batch = 8

    kx, kp = jax.random.split(key)
    x = jax.random.normal(kx, (batch, total_classes), jnp.float32)
    w1, b1, w2, b2 = init_params(kp, total_classes)

    out = attack_model_forward(x, w1, b1, w2, b2)
    out = jax.block_until_ready(out)

    # Pure-JAX f32 reference of the same math (kernel uses bf16 x/w1 -> loose tol).
    ref = jax.nn.sigmoid(jnp.maximum(x @ w1.T + b1, 0.0) @ w2.T + b2)
    assert out.shape == (batch, 2)
    assert jnp.allclose(out, ref, atol=2e-2, rtol=2e-2), (
        f"max abs diff {jnp.max(jnp.abs(out - ref))}")

    print("KERNEL_OK")
</pallas_src>

<mosaic_0001>
module attributes {stable_mosaic.version = 11 : i64} {
  func.func @attack_model_kernel(%arg0: i32, %arg1: memref<10x128xbf16, #tpu.memory_space<vmem>>, %arg2: memref<32x10xbf16, #tpu.memory_space<vmem>>, %arg3: memref<32x1xf32, #tpu.memory_space<vmem>>, %arg4: memref<2x32xf32, #tpu.memory_space<vmem>>, %arg5: memref<2x1xf32, #tpu.memory_space<vmem>>, %arg6: memref<2x128xf32, #tpu.memory_space<vmem>>) attributes {dimension_semantics = [#tpu.dimension_semantics<parallel>], iteration_bounds = array<i64: 1>, scalar_prefetch = 0 : i64, scratch_operands = 0 : i64, tpu.core_type = #tpu.core_type<tc>, window_params = [{transform_indices = @transform_0, window_bounds = array<i64: 10, 128>}, {pipeline_mode = #tpu.pipeline_mode<synchronous>, transform_indices = @transform_1, window_bounds = array<i64: 32, 10>}, {pipeline_mode = #tpu.pipeline_mode<synchronous>, transform_indices = @transform_2, window_bounds = array<i64: 32, 1>}, {pipeline_mode = #tpu.pipeline_mode<synchronous>, transform_indices = @transform_3, window_bounds = array<i64: 2, 32>}, {pipeline_mode = #tpu.pipeline_mode<synchronous>, transform_indices = @transform_4, window_bounds = array<i64: 2, 1>}, {transform_indices = @transform_5, window_bounds = array<i64: 2, 128>}]} {
    %c0 = arith.constant 0 : index
    %c0_0 = arith.constant 0 : index
    %0 = vector.load %arg2[%c0, %c0_0] : memref<32x10xbf16, #tpu.memory_space<vmem>>, vector<32x10xbf16>
    %c0_1 = arith.constant 0 : index
    %c0_2 = arith.constant 0 : index
    %1 = vector.load %arg1[%c0_1, %c0_2] : memref<10x128xbf16, #tpu.memory_space<vmem>>, vector<10x128xbf16>
    %cst = arith.constant dense<0.000000e+00> : vector<32x128xf32>
    %2 = tpu.matmul %0, %1, %cst {dimension_numbers = #tpu.dot_dimension_numbers<[1], [0], [0], [1], [0, 0, 1, 1], [], []>} : vector<32x10xbf16>, vector<10x128xbf16>, vector<32x128xf32> -> vector<32x128xf32>
    %c0_3 = arith.constant 0 : index
    %c0_4 = arith.constant 0 : index
    %3 = vector.load %arg3[%c0_3, %c0_4] : memref<32x1xf32, #tpu.memory_space<vmem>>, vector<32x1xf32>
    %4 = vector.broadcast %3 : vector<32x1xf32> to vector<32x128xf32>
    %5 = arith.addf %2, %4 : vector<32x128xf32>
    %cst_5 = arith.constant 0.000000e+00 : f32
    %6 = vector.broadcast %cst_5 : f32 to vector<32x128xf32>
    %7 = arith.maximumf %5, %6 : vector<32x128xf32>
    %c0_6 = arith.constant 0 : index
    %c0_7 = arith.constant 0 : index
    %8 = vector.load %arg4[%c0_6, %c0_7] : memref<2x32xf32, #tpu.memory_space<vmem>>, vector<2x32xf32>
    %cst_8 = arith.constant dense<0.000000e+00> : vector<2x128xf32>
    %9 = tpu.matmul %8, %7, %cst_8 {dimension_numbers = #tpu.dot_dimension_numbers<[1], [0], [0], [1], [0, 0, 1, 1], [], []>} : vector<2x32xf32>, vector<32x128xf32>, vector<2x128xf32> -> vector<2x128xf32>
    %c0_9 = arith.constant 0 : index
    %c0_10 = arith.constant 0 : index
    %10 = vector.load %arg5[%c0_9, %c0_10] : memref<2x1xf32, #tpu.memory_space<vmem>>, vector<2x1xf32>
    %11 = vector.broadcast %10 : vector<2x1xf32> to vector<2x128xf32>
    %12 = arith.addf %9, %11 : vector<2x128xf32>
    %13 = arith.negf %12 : vector<2x128xf32>
    %14 = math.exp %13 : vector<2x128xf32>
    %cst_11 = arith.constant 1.000000e+00 : f32
    %15 = vector.broadcast %cst_11 : f32 to vector<2x128xf32>
    %16 = arith.addf %15, %14 : vector<2x128xf32>
    %17 = arith.divf %15, %16 : vector<2x128xf32>
    %c0_12 = arith.constant 0 : index
    %c0_13 = arith.constant 0 : index
    %18 = vector.load %arg6[%c0_12, %c0_13] : memref<2x128xf32, #tpu.memory_space<vmem>>, vector<2x128xf32>
    tpu.vector_store %arg6[%c0_12, %c0_13], %17 {strides = array<i32>} : memref<2x128xf32, #tpu.memory_space<vmem>>, vector<2x128xf32>,
    return
  }
  func.func @transform_0(%arg0: i32) -> (i32, i32) {
    %c0_i32 = arith.constant 0 : i32
    %c0_i32_0 = arith.constant 0 : i32
    return %c0_i32, %arg0 : i32, i32
  }
  func.func @transform_1(%arg0: i32) -> (i32, i32) {
    %c0_i32 = arith.constant 0 : i32
    %c0_i32_0 = arith.constant 0 : i32
    %c0_i32_1 = arith.constant 0 : i32
    return %c0_i32, %c0_i32_0 : i32, i32
  }
  func.func @transform_2(%arg0: i32) -> (i32, i32) {
    %c0_i32 = arith.constant 0 : i32
    %c0_i32_0 = arith.constant 0 : i32
    %c0_i32_1 = arith.constant 0 : i32
    return %c0_i32, %c0_i32_0 : i32, i32
  }
  func.func @transform_3(%arg0: i32) -> (i32, i32) {
    %c0_i32 = arith.constant 0 : i32
    %c0_i32_0 = arith.constant 0 : i32
    %c0_i32_1 = arith.constant 0 : i32
    return %c0_i32, %c0_i32_0 : i32, i32
  }
  func.func @transform_4(%arg0: i32) -> (i32, i32) {
    %c0_i32 = arith.constant 0 : i32
    %c0_i32_0 = arith.constant 0 : i32
    %c0_i32_1 = arith.constant 0 : i32
    return %c0_i32, %c0_i32_0 : i32, i32
  }
  func.func @transform_5(%arg0: i32) -> (i32, i32) {
    %c0_i32 = arith.constant 0 : i32
    %c0_i32_0 = arith.constant 0 : i32
    return %c0_i32, %arg0 : i32, i32
  }
}

</mosaic_0001>

<bundles_post_ra>
// kernel: tpu_custom_call.1
= control target key start
LH: loop header
LB: loop body
LE: loop exit
PB: predicated region body
PF: predicated region fallthrough
CT: control target
= control target key end

     0   :  { %vm74_vm0 = vcmask 1044480   ;;  %v223_v5 = vmov 0   ;;  %s288_s0 = inlined_call_operand.vmem [shape: bf16[10,128], index: 0, kind: input, shape index: {}]   ;;  %s289_s1 = inlined_call_operand.vmem [shape: bf16[32,10], index: 1, kind: input, shape index: {}]   ;;  %s290_s2 = inlined_call_operand.vmem [shape: f32[32,1], index: 2, kind: input, shape index: {}]   ;;  %s291_s3 = inlined_call_operand.vmem [shape: f32[2,32], index: 3, kind: input, shape index: {}]   ;;  %s292_s4 = inlined_call_operand.vmem [shape: f32[2,1], index: 4, kind: input, shape index: {}]   ;;  %s293_s5 = inlined_call_operand.hbm [shape: f32[2,128], index: 5, kind: output, shape index: {}]  }
   0x1   :  { %v178_v0 = vld [vmem:[%s288_s0] sm:$0xf]  ;;  %v186_v1 = vld [vmem:[%s288_s0] sm:$0x10]  ;;  %v31_v3 = vld [vmem:[%s290_s2 + $0x18] sm:$0xff]  ;;  %190 = vset.pattern.permute.xlu0 %v223_v5  ;;  %191 = vset.pattern.permute.xlu1 %v223_v5 }
   0x2   :  { %v179_v2 = vor.u32 %v186_v1, %v178_v0  ;;  %v29_v4 = vld [vmem:[%s290_s2 + $0x8] sm:$0xff] }
   0x3   :  { %10 = vsyncpa [#allocation3], 0  ;;  %v185_v7 = vld [vmem:[%s289_s1 + $0x8] sm:$0xff]  ;;  %v184_v8 = vld [vmem:[%s289_s1] sm:$0xff]  ;;  %49 = vperm.xlu0 %190, %v31_v3   ;;  %39 = vperm.xlu1 %191, %v29_v4   ;;  %vm67_vm1 = vcmask 80896   ;;  %vm108_vm2 = vcmask 261120  }
   0x4   :  { %v76_v6 = vsel %vm74_vm0, %v179_v2, 0  ;;  %192 = vset.pattern.permute.xlu2 %v223_v5  ;;  %v30_v9 = vld [vmem:[%s290_s2 + $0x10] sm:$0xff]  ;;  %v28_v10 = vld [vmem:[%s290_s2] sm:$0xff]  ;;  %s224_s9 = smov [#allocation2]   ;;  %s159_s12 = sshll.u32 %s293_s5, 4  ;;  %s160_s12 = int_to_ptr.hbm [resolvable:$true] %s159_s12 }
   0x5   :  { %187 = vmatpush.bf16.msra.mxu2 %v76_v6  ;;  %85 = vmatpush.bf16.msra.mxu0 %v76_v6  ;;  %v102_v11 = vld [vmem:[%s292_s4] sm:$0x3] }
   0x6   :  { %105 = vperm.xlu2 %192, %v102_v11   ;;  %v101_v28 = vld [vmem:[%s291_s3] sm:$0x3]  ;;  %s157_s3 = sshll.u32 %s224_s9, 4  ;;  %s158_s3 = int_to_ptr.vmem [resolvable:$true] %s157_s3 }
   0x8   :  { %181 = vmatmul.msk.bf16.vlgmr.msra.gmra.mxu2 %vm67_vm1, %v185_v7  ;;  %180 = vmatmul.msk.bf16.vlgmr.msra.gmra.mxu0 %vm67_vm1, %v184_v8 }
   0xb   :  { %44 = vperm.xlu0 %190, %v30_v9   ;;  %34 = vperm.xlu1 %191, %v28_v10  }
  0x60   :  { %v106_v29 = vpop.permute.xlu2 %105 }
  0x75   :  { %v50_v12 = vpop.permute.xlu0 %49  ;;  %v40_v14 = vpop.permute.xlu1 %39 }
  0x7d   :  { %v45_v16 = vpop.permute.xlu0 %44  ;;  %v35_v21 = vpop.permute.xlu1 %34 }
  0x85   :  { %v87_v13 = vpop.f32.mrf.mxu0 }
  0x86   :  { %v88_v25 = vadd.f32 %v87_v13, %v35_v21 }
  0x88   :  { %v97_v27 = vmax.f32 %v88_v25, 0.0 }
  0x8b   :  { %v92_v15 = vpop.f32.mrf.mxu2 }
  0x8c   :  { %v93_v19 = vadd.f32 %v92_v15, %v45_v16 }
  0x8d   :  { %v89_v17 = vpop.f32.mrf.mxu0 }
  0x8e   :  { %v90_v22 = vadd.f32 %v89_v17, %v40_v14  ;;  %v99_v24 = vmax.f32 %v93_v19, 0.0 }
  0x90   :  { %v98_v26 = vmax.f32 %v90_v22, 0.0 }
  0x93   :  { %v94_v18 = vpop.f32.mrf.mxu2 }
  0x94   :  { %v95_v20 = vadd.f32 %v94_v18, %v50_v12 }
  0x96   :  { %v100_v23 = vmax.f32 %v95_v20, 0.0 }
  0x98   :  { %124 = vmatpush.msra.mxu1 %v100_v23 }
  0x9a   :  { %125 = vmatpush.msra.mxu1 %v99_v24 }
  0x9c   :  { %126 = vmatpush.msra.mxu1 %v98_v26 }
  0x9e   :  { %127 = vmatpush.msra.mxu1 %v97_v27 }
  0x9f   :  { %182 = vmatmul.msk.f32.vlgmr.msra.gmra.mxu1 %vm108_vm2, %v101_v28 }
 0x11c   :  { %v129_v30 = vpop.f32.mrf.mxu1 }
 0x11d   :  { %v130_v31 = vadd.f32 %v129_v30, %v106_v29 }
 0x11f   :  { %v183_v32 = vmul.f32 -1.442695, %v130_v31 }
 0x121   :  { %193 = vpow2.f32 %v183_v32 }
 0x127   :  { %v194_v33 = vpop.eup %193 }
 0x128   :  { %v135_v34 = vadd.f32 1.0, %v194_v33 }
 0x12a   :  { %195 = vrcp.f32 %v135_v34  ;;  %v147_v38 = vand.u32 2147483648, %v135_v34  ;;  %v145_v40 = vand.u32 2147483647, %v135_v34  ;;  %vm141_vm4 = vweird.f32 %v135_v34 }
 0x12c   :  { %v148_v42 = vor.u32 1.1754944e-38, %v147_v38  ;;  %vm146_vm6 = vcmp.eq.f32.partialorder %v145_v40, 8.507059e+37 }
 0x130   :  { %v196_v35 = vpop.eup %195 }
 0x131   :  { %v137_v36 = vmul.f32 %v196_v35, %v135_v34  ;;  %vm142_vm3 = vweird.f32 %v196_v35 }
 0x132   :  { %vm143_vm5 = vmor %vm141_vm4, %vm142_vm3 }
 0x133   :  { %v138_v37 = vsub.f32 1.0, %v137_v36 }
 0x135   :  { %v139_v39 = vmul.f32 %v196_v35, %v138_v37 }
 0x137   :  { %v140_v41 = vadd.f32 %v196_v35, %v139_v39 }
 0x139   :  { %v144_v43 = vsel %vm143_vm5, %v196_v35, %v140_v41 }
 0x13a   :  { %v149_v44 = vsel %vm146_vm6, %v148_v42, %v144_v43 }
 0x13b   :  { %151 = vst [vmem:[#allocation2] sm:$0x3] %v149_v44 }
 0x13c   :  { %162 = dma.vmem_to_hbm [thread:$0]  %s158_s3, 32, %s160_s12, [#allocation3]  }
 0x13d   :  { %221 = dma.done.wait [#allocation3], 32  }
 0x13e   :  { %222 = vsyncadd [#allocation3], 4294967264 }
 0x13f   :  { %167 = vsyncpa [#allocation3], 1 }

</bundles_post_ra>
